<compile_context>
chip_gen: v6e
topology: v6e:2x2x1
jax: 0.10.0
libtpu: 0.0.40
codegen_flags: <defaults>
</compile_context>

<pallas_src>
import jax
import jax.numpy as jnp
from jax.experimental import pallas as pl
from jax.experimental.pallas import tpu as pltpu

NEG_SLOPE = 0.01  # torch.nn.LeakyReLU default negative_slope


def _make_mlp_kernel(num_linear):
    """Build a fused-MLP kernel over refs laid out as [x, W1, b1, ..., Wn, bn, out]."""
    def kernel(*refs):
        x_ref, out_ref = refs[0], refs[-1]
        h = x_ref[...]                                    # bf16 activations
        for i in range(num_linear):
            w_ref = refs[1 + 2 * i]
            b_ref = refs[2 + 2 * i]
            y = jnp.dot(h.astype(w_ref.dtype), w_ref[...],
                        preferred_element_type=jnp.float32) + b_ref[...]
            if i < num_linear - 1:
                h = jnp.maximum(y, NEG_SLOPE * y)         # LeakyReLU in f32
            else:
                out_ref[...] = y.astype(out_ref.dtype)
    return kernel


def predictor_mlp_forward(x, params):
    """x: [B, input_size] float32. params: list of (W [in, out], b [1, out]) float32."""
    B = x.shape[0]
    num_linear = len(params)
    d_out = params[-1][0].shape[1]

    # bf16 at the HBM->VMEM boundary; biases stay f32 (tiny, added post-accumulation).
    args = [x.astype(jnp.bfloat16)]
    flops = 0
    bytes_accessed = x.size * 2 + B * d_out * 4
    for w, b in params:
        args.append(w.astype(jnp.bfloat16))
        args.append(b.astype(jnp.float32))
        flops += 2 * B * w.shape[0] * w.shape[1]
        bytes_accessed += w.size * 2 + b.size * 4

    vmem = pl.BlockSpec(memory_space=pltpu.MemorySpace.VMEM)
    return pl.pallas_call(
        _make_mlp_kernel(num_linear),
        out_shape=jax.ShapeDtypeStruct((B, d_out), jnp.float32),
        in_specs=[vmem] * len(args),
        out_specs=vmem,
        cost_estimate=pl.CostEstimate(
            flops=flops, transcendentals=0, bytes_accessed=bytes_accessed),
    )(*args)


def init_params(key, input_size, dense_size, num_layers=2, init_scale=2.0 ** 0.5):
    """PyTorch-equivalent init: orthogonal(gain) weights, default-uniform biases.
    Weights stored pre-transposed as [in, out]."""
    orth = jax.nn.initializers.orthogonal(scale=init_scale)
    params = []
    in_size = input_size
    dims = [dense_size] * num_layers + [dense_size]   # num_layers hidden + final Linear
    for d in dims:
        key, kw, kb = jax.random.split(key, 3)
        w = orth(kw, (in_size, d), jnp.float32)
        bound = 1.0 / (in_size ** 0.5)
        b = jax.random.uniform(kb, (1, d), jnp.float32, -bound, bound)
        params.append((w, b))
        in_size = d
    return params


def _reference_forward(x, params):
    """Pure-JAX f32 reference mirroring PredictorMLP.forward."""
    h = x
    n = len(params)
    for i, (w, b) in enumerate(params):
        h = h @ w + b
        if i < n - 1:
            h = jnp.where(h >= 0, h, NEG_SLOPE * h)
    return h


if __name__ == "__main__":
    B = 2
    input_size = 4 * 16 * 16      # e.g. a flattened 4x16x16 observation
    dense_size = 128              # lane-aligned per perf feedback (module default is 64)
    num_layers = 2

    key = jax.random.PRNGKey(0)
    k_x, k_p = jax.random.split(key)
    x = jax.random.normal(k_x, (B, input_size), jnp.float32)
    params = init_params(k_p, input_size, dense_size, num_layers)

    out = predictor_mlp_forward(x, params)
    jax.block_until_ready(out)

    ref = _reference_forward(x, params)
    assert out.shape == (B, dense_size)
    # bf16 weight/activation streaming -> compare against the f32 reference with
    # a loosened tolerance (per the perf review's correctness note).
    assert jnp.allclose(out, ref, rtol=5e-2, atol=5e-2), (
        float(jnp.max(jnp.abs(out - ref))))

    print("KERNEL_OK")
</pallas_src>

<mosaic_0001>
module attributes {stable_mosaic.version = 11 : i64} {
  func.func @kernel(%arg0: memref<2x1024xbf16, #tpu.memory_space<vmem>>, %arg1: memref<1024x128xbf16, #tpu.memory_space<vmem>>, %arg2: memref<1x128xf32, #tpu.memory_space<vmem>>, %arg3: memref<128x128xbf16, #tpu.memory_space<vmem>>, %arg4: memref<1x128xf32, #tpu.memory_space<vmem>>, %arg5: memref<128x128xbf16, #tpu.memory_space<vmem>>, %arg6: memref<1x128xf32, #tpu.memory_space<vmem>>, %arg7: memref<2x128xf32, #tpu.memory_space<vmem>>) attributes {dimension_semantics = [], scalar_prefetch = 0 : i64, scratch_operands = 0 : i64, tpu.core_type = #tpu.core_type<tc>} {
    %c0 = arith.constant 0 : index
    %c0_0 = arith.constant 0 : index
    %0 = vector.load %arg0[%c0, %c0_0] : memref<2x1024xbf16, #tpu.memory_space<vmem>>, vector<2x1024xbf16>
    %c0_1 = arith.constant 0 : index
    %c0_2 = arith.constant 0 : index
    %1 = vector.load %arg1[%c0_1, %c0_2] : memref<1024x128xbf16, #tpu.memory_space<vmem>>, vector<1024x128xbf16>
    %cst = arith.constant dense<0.000000e+00> : vector<2x128xf32>
    %2 = tpu.matmul %0, %1, %cst {dimension_numbers = #tpu.dot_dimension_numbers<[1], [0], [0], [1], [0, 0, 1, 1], [], []>} : vector<2x1024xbf16>, vector<1024x128xbf16>, vector<2x128xf32> -> vector<2x128xf32>
    %c0_3 = arith.constant 0 : index
    %c0_4 = arith.constant 0 : index
    %3 = vector.load %arg2[%c0_3, %c0_4] : memref<1x128xf32, #tpu.memory_space<vmem>>, vector<1x128xf32>
    %4 = vector.broadcast %3 : vector<1x128xf32> to vector<2x128xf32>
    %5 = arith.addf %2, %4 : vector<2x128xf32>
    %cst_5 = arith.constant 0.00999999977 : f32
    %6 = vector.broadcast %cst_5 : f32 to vector<2x128xf32>
    %7 = arith.mulf %6, %5 : vector<2x128xf32>
    %8 = arith.maximumf %5, %7 : vector<2x128xf32>
    %9 = arith.truncf %8 : vector<2x128xf32> to vector<2x128xbf16>
    %c0_6 = arith.constant 0 : index
    %c0_7 = arith.constant 0 : index
    %10 = vector.load %arg3[%c0_6, %c0_7] : memref<128x128xbf16, #tpu.memory_space<vmem>>, vector<128x128xbf16>
    %cst_8 = arith.constant dense<0.000000e+00> : vector<2x128xf32>
    %11 = tpu.matmul %9, %10, %cst_8 {dimension_numbers = #tpu.dot_dimension_numbers<[1], [0], [0], [1], [0, 0, 1, 1], [], []>} : vector<2x128xbf16>, vector<128x128xbf16>, vector<2x128xf32> -> vector<2x128xf32>
    %c0_9 = arith.constant 0 : index
    %c0_10 = arith.constant 0 : index
    %12 = vector.load %arg4[%c0_9, %c0_10] : memref<1x128xf32, #tpu.memory_space<vmem>>, vector<1x128xf32>
    %13 = vector.broadcast %12 : vector<1x128xf32> to vector<2x128xf32>
    %14 = arith.addf %11, %13 : vector<2x128xf32>
    %cst_11 = arith.constant 0.00999999977 : f32
    %15 = vector.broadcast %cst_11 : f32 to vector<2x128xf32>
    %16 = arith.mulf %15, %14 : vector<2x128xf32>
    %17 = arith.maximumf %14, %16 : vector<2x128xf32>
    %18 = arith.truncf %17 : vector<2x128xf32> to vector<2x128xbf16>
    %c0_12 = arith.constant 0 : index
    %c0_13 = arith.constant 0 : index
    %19 = vector.load %arg5[%c0_12, %c0_13] : memref<128x128xbf16, #tpu.memory_space<vmem>>, vector<128x128xbf16>
    %cst_14 = arith.constant dense<0.000000e+00> : vector<2x128xf32>
    %20 = tpu.matmul %18, %19, %cst_14 {dimension_numbers = #tpu.dot_dimension_numbers<[1], [0], [0], [1], [0, 0, 1, 1], [], []>} : vector<2x128xbf16>, vector<128x128xbf16>, vector<2x128xf32> -> vector<2x128xf32>
    %c0_15 = arith.constant 0 : index
    %c0_16 = arith.constant 0 : index
    %21 = vector.load %arg6[%c0_15, %c0_16] : memref<1x128xf32, #tpu.memory_space<vmem>>, vector<1x128xf32>
    %22 = vector.broadcast %21 : vector<1x128xf32> to vector<2x128xf32>
    %23 = arith.addf %20, %22 : vector<2x128xf32>
    %c0_17 = arith.constant 0 : index
    %c0_18 = arith.constant 0 : index
    %24 = vector.load %arg7[%c0_17, %c0_18] : memref<2x128xf32, #tpu.memory_space<vmem>>, vector<2x128xf32>
    tpu.vector_store %arg7[%c0_17, %c0_18], %23 {strides = array<i32>} : memref<2x128xf32, #tpu.memory_space<vmem>>, vector<2x128xf32>,
    return
  }
}

</mosaic_0001>

<bundles_post_ra>
// kernel: tpu_custom_call.1
= control target key start
LH: loop header
LB: loop body
LE: loop exit
PB: predicated region body
PF: predicated region fallthrough
CT: control target
= control target key end

     0   :  { %12 = vsyncpa [#allocation3], 0  ;;  %s1607_s0 = inlined_call_operand.hbm [shape: bf16[2,1024], index: 0, kind: input, shape index: {}]   ;;  %s1608_s1 = inlined_call_operand.hbm [shape: bf16[1024,128], index: 1, kind: input, shape index: {}]   ;;  %s1609_s2 = inlined_call_operand.vmem [shape: f32[1,128], index: 2, kind: input, shape index: {}]   ;;  %s1610_s3 = inlined_call_operand.hbm [shape: bf16[128,128], index: 3, kind: input, shape index: {}]   ;;  %s1611_s4 = inlined_call_operand.vmem [shape: f32[1,128], index: 4, kind: input, shape index: {}]   ;;  %s1612_s5 = inlined_call_operand.hbm [shape: bf16[128,128], index: 5, kind: input, shape index: {}]   ;;  %s1613_s6 = inlined_call_operand.vmem [shape: f32[1,128], index: 6, kind: input, shape index: {}]   ;;  %s1614_s7 = inlined_call_operand.hbm [shape: f32[2,128], index: 7, kind: output, shape index: {}]  }
   0x1   :  { %13 = vsyncpa [#allocation6], 0 }
   0x2   :  { %14 = vsyncpa [#allocation9], 0 }
   0x3   :  { %15 = vsyncpa [#allocation4], 0  ;;  %s1493_s24 = smov [#allocation5]  }
   0x4   :  { %s31_s25 = sshll.u32 %s1493_s24, 4  ;;  %s32_s25 = int_to_ptr.vmem [resolvable:$true] %s31_s25 }
   0x5   :  { %s1393_s26 = scalar_lea.vmem %s32_s25, 8192  ;;  %p1398_p1 = scmp.lt.s32.totalorder %s32_s25, %s32_s25 }
   0x6   :  { %p1394_p0 = scmp.ne.s32.totalorder %s32_s25, %s1393_s26  ;;  %p1399_p2 = scmp.lt.s32.totalorder %s1393_s26, %s1393_s26 }
   0x8   :  { %p1400_p3 = por %p1399_p2, %p1398_p1 }
   0xa   :  { %p1401_p4 = pnand %p1400_p3, %p1394_p0 }
   0xc   :  { %1404 = shalt.err (!%p1401_p4)
}
   0xd   :  { %s1494_s27 = smov 64   ;;  %s1495_s28 = smov 4  }
   0xe   :  { %37 = dma.hbm_to_vmem [thread:$0]  %s1608_s1, 8192, %s32_s25, [#allocation6], %s1494_s27, %s1494_s27, %s1495_s28  }
   0xf   :  { %s1496_s8 = smov [#allocation2]   ;;  %s1497_s10 = smov [#allocation7]  }
  0x10   :  { %s22_s9 = sshll.u32 %s1496_s8, 4  ;;  %s45_s11 = sshll.u32 %s1497_s10, 4  ;;  %s23_s9 = int_to_ptr.vmem [resolvable:$true] %s22_s9  ;;  %s46_s11 = int_to_ptr.vmem [resolvable:$true] %s45_s11 }
  0x11   :  { %s1413_s12 = scalar_lea.vmem %s23_s9, 128  ;;  %p1418_p6 = scmp.lt.s32.totalorder %s23_s9, %s23_s9 }
  0x12   :  { %p1414_p5 = scmp.ne.s32.totalorder %s23_s9, %s1413_s12  ;;  %p1419_p7 = scmp.lt.s32.totalorder %s1413_s12, %s1413_s12 }
  0x14   :  { %p1420_p8 = por %p1419_p7, %p1418_p6 }
  0x16   :  { %p1421_p9 = pnand %p1420_p8, %p1414_p5 }
  0x18   :  { %1424 = shalt.err (!%p1421_p9)
}
  0x19   :  { %25 = dma.hbm_to_vmem [thread:$0]  %s1607_s0, 128, %s23_s9, [#allocation3]  }
  0x1a   :  { %s1433_s15 = scalar_lea.vmem %s46_s11, 1024  ;;  %p1438_p11 = scmp.lt.s32.totalorder %s46_s11, %s46_s11 }
  0x1b   :  { %p1434_p10 = scmp.ne.s32.totalorder %s46_s11, %s1433_s15  ;;  %p1439_p12 = scmp.lt.s32.totalorder %s1433_s15, %s1433_s15 }
  0x1d   :  { %p1440_p13 = por %p1439_p12, %p1438_p11 }
  0x1f   :  { %p1441_p0 = pnand %p1440_p13, %p1434_p10 }
  0x21   :  { %1444 = shalt.err (!%p1441_p0)
}
  0x22   :  { %51 = dma.hbm_to_vmem [thread:$0]  %s1610_s3, 1024, %s46_s11, [#allocation6], %s1494_s27, %s1494_s27, %s1495_s28  }
  0x23   :  { %s1498_s17 = smov [#allocation8]  }
  0x24   :  { %s59_s18 = sshll.u32 %s1498_s17, 4  ;;  %s60_s18 = int_to_ptr.vmem [resolvable:$true] %s59_s18 }
  0x25   :  { %s1453_s19 = scalar_lea.vmem %s60_s18, 1024  ;;  %p1458_p2 = scmp.lt.s32.totalorder %s60_s18, %s60_s18 }
  0x26   :  { %p1454_p1 = scmp.ne.s32.totalorder %s60_s18, %s1453_s19  ;;  %p1459_p3 = scmp.lt.s32.totalorder %s1453_s19, %s1453_s19 }
  0x28   :  { %p1460_p4 = por %p1459_p3, %p1458_p2 }
  0x2a   :  { %p1461_p5 = pnand %p1460_p4, %p1454_p1 }
  0x2c   :  { %1464 = shalt.err (!%p1461_p5)
}
  0x2d   :  { %65 = dma.hbm_to_vmem [thread:$0]  %s1612_s5, 1024, %s60_s18, [#allocation9], %s1494_s27, %s1494_s27, %s1495_s28  }
  0x2e   :  { %1485 = dma.done.wait [#allocation3], 128  }
  0x2f   :  { %1486 = vsyncadd [#allocation3], 4294967168 }
  0x30   :  { %1487 = dma.done.wait [#allocation6], 9216  }
  0x31   :  { %1488 = vsyncadd [#allocation6], 4294958080 }
  0x32   :  { %1489 = dma.done.wait [#allocation9], 1024  }
  0x33   :  { %1490 = vsyncadd [#allocation9], 4294966272  ;;  %v1304_v0 = vld [vmem:[#allocation5 + $0x78] sm:$0xff]   ;;  %v1308_v4 = vld [vmem:[#allocation5 + $0x70] sm:$0xff]   ;;  %v1499_v22 = vmov 1966171168   ;;  %v222_v24 = vlaneseq }
  0x34   :  { %v1305_v1 = vld [vmem:[#allocation5 + $0xf8] sm:$0xff]   ;;  %1148 = vmatprep.subr.bf16.mxu0 %v1304_v0  ;;  %v1309_v5 = vld [vmem:[#allocation5 + $0xf0] sm:$0xff]   ;;  %v1312_v8 = vld [vmem:[#allocation5 + $0x68] sm:$0xff]   ;;  %v220_v23 = vunpack.c.l.s4 %v1499_v22  ;;  %vm1501_vm0 = vmmov 0   ;;  %s1502_s24 = smov [#allocation10]  }
  0x35   :  { %v1306_v2 = vld [vmem:[#allocation5 + $0x38] sm:$0xff]   ;;  %1170 = vmatprep.subr.bf16.mxu1 %v1305_v1  ;;  %v1310_v6 = vld [vmem:[#allocation5 + $0x30] sm:$0xff]   ;;  %v1313_v9 = vld [vmem:[#allocation5 + $0xe8] sm:$0xff]   ;;  %v223_v30 = vshrl.u32 %v222_v24, 7  ;;  %s1054_s25 = sshll.u32 %s1502_s24, 4  ;;  %s1055_s25 = int_to_ptr.vmem [resolvable:$true] %s1054_s25 }
  0x36   :  { %v1307_v3 = vld [vmem:[#allocation5 + $0xb8] sm:$0xff]   ;;  %1149 = vmatpush3.bf16.msra.mxu0 %v1306_v2  ;;  %v1311_v7 = vld [vmem:[#allocation5 + $0xb0] sm:$0xff]   ;;  %v1314_v10 = vld [vmem:[#allocation5 + $0x28] sm:$0xff]   ;;  %v221_v29 = vunpack.c.0.s8 %v220_v23  ;;  %p1470_p7 = scmp.lt.s32.totalorder %s1055_s25, %s1055_s25 }
  0x37   :  { %1171 = vmatpush3.bf16.msra.mxu1 %v1307_v3  ;;  %1150 = vmatprep.subr.bf16.mxu0 %v1308_v4  ;;  %v1315_v11 = vld [vmem:[#allocation5 + $0xa8] sm:$0xff]   ;;  %v1316_v12 = vld [vmem:[#allocation5 + $0x60] sm:$0xff]   ;;  %v1320_v16 = vld [vmem:[#allocation5 + $0x58] sm:$0xff]  }
  0x38   :  { %1172 = vmatprep.subr.bf16.mxu1 %v1309_v5  ;;  %v1317_v13 = vld [vmem:[#allocation5 + $0xe0] sm:$0xff]   ;;  %v1321_v17 = vld [vmem:[#allocation5 + $0xd8] sm:$0xff]   ;;  %v1324_v20 = vld [vmem:[#allocation5 + $0x50] sm:$0xff]   ;;  %v1564_v35 = vsub.s32 %v221_v29, %v223_v30 }
  0x39   :  { %v1318_v14 = vld [vmem:[#allocation5 + $0x20] sm:$0xff]   ;;  %v1322_v18 = vld [vmem:[#allocation5 + $0x18] sm:$0xff]   ;;  %v1325_v21 = vld [vmem:[#allocation5 + $0xd0] sm:$0xff]  }
  0x3a   :  { %1151 = vmatpush3.bf16.msra.mxu0 %v1310_v6  ;;  %v1319_v15 = vld [vmem:[#allocation5 + $0xa0] sm:$0xff]   ;;  %v1323_v19 = vld [vmem:[#allocation5 + $0x98] sm:$0xff]   ;;  %v1326_v25 = vld [vmem:[#allocation5 + $0x10] sm:$0xff]  }
  0x3b   :  { %1173 = vmatpush3.bf16.msra.mxu1 %v1311_v7  ;;  %1152 = vmatprep.subr.bf16.mxu0 %v1312_v8  ;;  %v1327_v26 = vld [vmem:[#allocation5 + $0x90] sm:$0xff]   ;;  %v1328_v27 = vld [vmem:[#allocation5 + $0x48] sm:$0xff]   ;;  %v1332_v33 = vld [vmem:[#allocation5 + $0x40] sm:$0xff]  }
  0x3c   :  { %1174 = vmatprep.subr.bf16.mxu1 %v1313_v9  ;;  %v1329_v28 = vld [vmem:[#allocation5 + $0xc8] sm:$0xff]   ;;  %v1333_v34 = vld [vmem:[#allocation5 + $0xc0] sm:$0xff]   ;;  %v81_v38 = vld [vmem:[#allocation2] sm:$0xff] }
  0x3d   :  { %v1330_v31 = vld [vmem:[#allocation5 + $0x8] sm:$0xff]   ;;  %v1334_v36 = vld [vmem:[#allocation5] sm:$0xff]   ;;  %v218_v39 = vcombine.high %v81_v38, %v81_v38  ;;  %v225_v40 = vrot.slane %v81_v38, %v1564_v35  ;;  %v1337_v41 = vld [vmem:[#allocation5 + $0x178] sm:$0xff]  }
  0x3e   :  { %1153 = vmatpush3.bf16.msra.mxu0 %v1314_v10  ;;  %v1331_v32 = vld [vmem:[#allocation5 + $0x88] sm:$0xff]   ;;  %v1335_v37 = vld [vmem:[#allocation5 + $0x80] sm:$0xff]   ;;  %v1338_v42 = vld [vmem:[#allocation5 + $0x1f8] sm:$0xff]  }
  0x3f   :  { %1175 = vmatpush3.bf16.msra.mxu1 %v1315_v11  ;;  %1154 = vmatprep.subr.bf16.mxu0 %v1316_v12  ;;  %v233_v43 = vcombine.high %v225_v40, %v225_v40  ;;  %v241_v44 = vrot.slane %v225_v40, %v1564_v35  ;;  %v1569_v45 = vrot.slane %v218_v39, %v1564_v35  ;;  %v1339_v46 = vld [vmem:[#allocation5 + $0x138] sm:$0xff]   ;;  %v1341_v51 = vld [vmem:[#allocation5 + $0x170] sm:$0xff]   ;;  %v1345_v58 = vld [vmem:[#allocation5 + $0x168] sm:$0xff]  }
  0x40   :  { %1176 = vmatprep.subr.bf16.mxu1 %v1317_v13  ;;  %v1340_v48 = vld [vmem:[#allocation5 + $0x1b8] sm:$0xff]   ;;  %v1342_v53 = vld [vmem:[#allocation5 + $0x1f0] sm:$0xff]   ;;  %v1346_v59 = vld [vmem:[#allocation5 + $0x1e8] sm:$0xff]  }
  0x41   :  { %v255_v47 = vrot.slane %v233_v43, %v1564_v35  ;;  %v234_v49 = vcombine.high %v1569_v45, %v1569_v45  ;;  %v263_v50 = vcombine.high %v241_v44, %v241_v44  ;;  %v1343_v55 = vld [vmem:[#allocation5 + $0x130] sm:$0xff]   ;;  %v1347_v60 = vld [vmem:[#allocation5 + $0x128] sm:$0xff]   ;;  %v1349_v62 = vld [vmem:[#allocation5 + $0x160] sm:$0xff]  }
  0x42   :  { %1155 = vmatpush3.bf16.msra.mxu0 %v1318_v14  ;;  %v1344_v56 = vld [vmem:[#allocation5 + $0x1b0] sm:$0xff]   ;;  %v1348_v61 = vld [vmem:[#allocation5 + $0x1a8] sm:$0xff]   ;;  %v1350_v63 = vld [vmem:[#allocation5 + $0x1e0] sm:$0xff]  }
  0x43   :  { %1177 = vmatpush3.bf16.msra.mxu1 %v1319_v15  ;;  %1156 = vmatprep.subr.bf16.mxu0 %v1320_v16  ;;  %v265_v52 = vcombine.high %v255_v47, %v255_v47  ;;  %v262_v54 = vrot.slane %v234_v49, %v1564_v35  ;;  %v1351_v0 = vld [vmem:[#allocation5 + $0x120] sm:$0xff]   ;;  %v1353_v2 = vld [vmem:[#allocation5 + $0x158] sm:$0xff]   ;;  %v1357_v6 = vld [vmem:[#allocation5 + $0x150] sm:$0xff]  }
  0x44   :  { %1178 = vmatprep.subr.bf16.mxu1 %v1321_v17  ;;  %691 = vmatprep.mubr.bf16.mxu0 %v255_v47  ;;  %v1352_v1 = vld [vmem:[#allocation5 + $0x1a0] sm:$0xff]   ;;  %v1354_v3 = vld [vmem:[#allocation5 + $0x1d8] sm:$0xff]   ;;  %v1358_v7 = vld [vmem:[#allocation5 + $0x1d0] sm:$0xff]  }
  0x45   :  { %731 = vmatprep.mubr.bf16.mxu1 %v265_v52  ;;  %v266_v57 = vcombine.high %v262_v54, %v262_v54  ;;  %v1355_v4 = vld [vmem:[#allocation5 + $0x118] sm:$0xff]   ;;  %v1359_v8 = vld [vmem:[#allocation5 + $0x110] sm:$0xff]   ;;  %v1361_v10 = vld [vmem:[#allocation5 + $0x148] sm:$0xff]  }
  0x46   :  { %1157 = vmatpush3.bf16.msra.mxu0 %v1322_v18  ;;  %v1356_v5 = vld [vmem:[#allocation5 + $0x198] sm:$0xff]   ;;  %v1360_v9 = vld [vmem:[#allocation5 + $0x190] sm:$0xff]   ;;  %v1362_v11 = vld [vmem:[#allocation5 + $0x1c8] sm:$0xff]   ;;  %v248_v18 = vrot.slane %v1569_v45, %v1564_v35 }
  0x47   :  { %1179 = vmatpush3.bf16.msra.mxu1 %v1323_v19  ;;  %1158 = vmatprep.subr.bf16.mxu0 %v1324_v20  ;;  %v1363_v12 = vld [vmem:[#allocation5 + $0x108] sm:$0xff]   ;;  %v1365_v14 = vld [vmem:[#allocation5 + $0x140] sm:$0xff]   ;;  %v1369_v20 = vld [vmem:[#allocation7 + $0x38] sm:$0xff]  }
  0x48   :  { %1180 = vmatprep.subr.bf16.mxu1 %v1325_v21  ;;  %v1364_v13 = vld [vmem:[#allocation5 + $0x188] sm:$0xff]   ;;  %v1366_v15 = vld [vmem:[#allocation5 + $0x1c0] sm:$0xff]   ;;  %v264_v19 = vcombine.high %v248_v18, %v248_v18  ;;  %v1500_v21 = vmov 0.0   ;;  %v1370_v22 = vld [vmem:[#allocation7 + $0x30] sm:$0xff]  }
  0x49   :  { %v1367_v16 = vld [vmem:[#allocation5 + $0x100] sm:$0xff]   ;;  %v1371_v23 = vld [vmem:[#allocation7 + $0x28] sm:$0xff]   ;;  %v1377_v29 = vld [vmem:[#allocation8 + $0x38] sm:$0xff]  }
  0x4a   :  { %1159 = vmatpush3.bf16.msra.mxu0 %v1326_v25  ;;  %v1368_v17 = vld [vmem:[#allocation5 + $0x180] sm:$0xff]   ;;  %v1373_v25 = vld [vmem:[#allocation7 + $0x18] sm:$0xff]   ;;  %v1378_v30 = vld [vmem:[#allocation8 + $0x30] sm:$0xff]  }
  0x4b   :  { %1181 = vmatpush3.bf16.msra.mxu1 %v1327_v26  ;;  %1160 = vmatprep.subr.bf16.mxu0 %v1328_v27  ;;  %v1372_v24 = vld [vmem:[#allocation7 + $0x20] sm:$0xff]   ;;  %v1374_v26 = vld [vmem:[#allocation7 + $0x10] sm:$0xff]   ;;  %v1375_v27 = vld [vmem:[#allocation7 + $0x8] sm:$0xff]  }
  0x4c   :  { %1182 = vmatprep.subr.bf16.mxu1 %v1329_v28  ;;  %v1376_v28 = vld [vmem:[#allocation7] sm:$0xff]  }
  0x4e   :  { %1161 = vmatpush3.bf16.msra.mxu0 %v1330_v31  ;;  %v1379_v31 = vld [vmem:[#allocation8 + $0x28] sm:$0xff]  }
  0x4f   :  { %1183 = vmatpush3.bf16.msra.mxu1 %v1331_v32  ;;  %1162 = vmatprep.subr.bf16.mxu0 %v1332_v33  ;;  %v1380_v32 = vld [vmem:[#allocation8 + $0x20] sm:$0xff]   ;;  %v1381_v33 = vld [vmem:[#allocation8 + $0x18] sm:$0xff]  }
  0x50   :  { %1184 = vmatprep.subr.bf16.mxu1 %v1333_v34  ;;  %v1382_v34 = vld [vmem:[#allocation8 + $0x10] sm:$0xff]  }
  0x52   :  { %1163 = vmatpush3.bf16.msra.mxu0 %v1334_v36 }
  0x53   :  { %1185 = vmatpush3.bf16.msra.mxu1 %v1335_v37  ;;  %1192 = vmatprep.subr.bf16.mxu0 %v1337_v41 }
  0x54   :  { %1214 = vmatprep.subr.bf16.mxu1 %v1338_v42 }
  0x55   :  { %692 = vmatmul.mubr.bf16.vlgmr.msra.gmra.mxu0 %v241_v44  ;;  %v1065_v44 = vld [vmem:[%s1609_s2] ss:$0 sm:$0xff] }
  0x56   :  { %1193 = vmatpush3.bf16.msra.mxu0 %v1339_v46  ;;  %732 = vmatmul.mubr.bf16.vlgmr.msra.gmra.mxu1 %v263_v50 }
  0x57   :  { %1194 = vmatprep.subr.bf16.mxu0 %v1341_v51  ;;  %1215 = vmatpush3.bf16.msra.mxu1 %v1340_v48 }
  0x58   :  { %771 = vmatprep.mubr.bf16.mxu0 %v262_v54  ;;  %1216 = vmatprep.subr.bf16.mxu1 %v1342_v53 }
  0x59   :  { %811 = vmatprep.mubr.bf16.mxu1 %v266_v57 }
  0x5a   :  { %1195 = vmatpush3.bf16.msra.mxu0 %v1343_v55 }
  0x5b   :  { %1196 = vmatprep.subr.bf16.mxu0 %v1345_v58  ;;  %1217 = vmatpush3.bf16.msra.mxu1 %v1344_v56 }
  0x5c   :  { %1218 = vmatprep.subr.bf16.mxu1 %v1346_v59 }
  0x5e   :  { %1197 = vmatpush3.bf16.msra.mxu0 %v1347_v60 }
  0x5f   :  { %1198 = vmatprep.subr.bf16.mxu0 %v1349_v62  ;;  %1219 = vmatpush3.bf16.msra.mxu1 %v1348_v61 }
  0x60   :  { %1220 = vmatprep.subr.bf16.mxu1 %v1350_v63  ;;  %v1383_v63 = vld [vmem:[#allocation8 + $0x8] sm:$0xff]  }
  0x62   :  { %1199 = vmatpush3.bf16.msra.mxu0 %v1351_v0  ;;  %v1384_v0 = vld [vmem:[#allocation8] sm:$0xff]  }
  0x63   :  { %1200 = vmatprep.subr.bf16.mxu0 %v1353_v2  ;;  %1221 = vmatpush3.bf16.msra.mxu1 %v1352_v1  ;;  %v1130_v1 = vld [vmem:[%s1611_s4] ss:$0 sm:$0xff]  ;;  %s1465_s4 = scalar_lea.vmem %s1055_s25, 32 }
  0x64   :  { %1222 = vmatprep.subr.bf16.mxu1 %v1354_v3  ;;  %p1466_p6 = scmp.ne.s32.totalorder %s1055_s25, %s1465_s4  ;;  %p1471_p8 = scmp.lt.s32.totalorder %s1465_s4, %s1465_s4 }
  0x66   :  { %1201 = vmatpush3.bf16.msra.mxu0 %v1355_v4  ;;  %p1472_p9 = por %p1471_p8, %p1470_p7 }
  0x67   :  { %1202 = vmatprep.subr.bf16.mxu0 %v1357_v6  ;;  %1223 = vmatpush3.bf16.msra.mxu1 %v1356_v5 }
  0x68   :  { %1224 = vmatprep.subr.bf16.mxu1 %v1358_v7  ;;  %p1473_p10 = pnand %p1472_p9, %p1466_p6 }
  0x6a   :  { %1203 = vmatpush3.bf16.msra.mxu0 %v1359_v8 }
  0x6b   :  { %1204 = vmatprep.subr.bf16.mxu0 %v1361_v10  ;;  %1225 = vmatpush3.bf16.msra.mxu1 %v1360_v9  ;;  %v1139_v10 = vld [vmem:[%s1613_s6] ss:$0 sm:$0xff] }
  0x6c   :  { %1226 = vmatprep.subr.bf16.mxu1 %v1362_v11 }
  0x6e   :  { %1205 = vmatpush3.bf16.msra.mxu0 %v1363_v12 }
  0x6f   :  { %1206 = vmatprep.subr.bf16.mxu0 %v1365_v14  ;;  %1227 = vmatpush3.bf16.msra.mxu1 %v1364_v13 }
  0x70   :  { %1228 = vmatprep.subr.bf16.mxu1 %v1366_v15 }
  0x72   :  { %1207 = vmatpush3.bf16.msra.mxu0 %v1367_v16 }
  0x73   :  { %1229 = vmatpush3.bf16.msra.mxu1 %v1368_v17  ;;  %1254 = vmatprep.subr.bf16.mxu0 %v1500_v21 }
  0x74   :  { %1274 = vmatprep.subr.bf16.mxu1 %v1500_v21 }
  0x75   :  { %772 = vmatmul.mubr.bf16.vlgmr.msra.gmra.mxu0 %v248_v18 }
  0x76   :  { %812 = vmatmul.mubr.bf16.vlgmr.msra.gmra.mxu1 %v264_v19  ;;  %1255 = vmatpush3.bf16.msra.mxu0 %v1369_v20 }
  0x77   :  { %1256 = vmatprep.subr.bf16.mxu0 %v1500_v21  ;;  %1270 = vmatprep.mubr.msk.bf16.mxu0 %vm1501_vm0, %v1500_v21 }
  0x78   :  { %1290 = vmatprep.mubr.msk.bf16.mxu1 %vm1501_vm0, %v1500_v21  ;;  %1275 = vmatpush3.bf16.msra.mxu1 %v1377_v29 }
  0x79   :  { %1276 = vmatprep.subr.bf16.mxu1 %v1500_v21 }
  0x7a   :  { %1257 = vmatpush3.bf16.msra.mxu0 %v1370_v22 }
  0x7b   :  { %1258 = vmatprep.subr.bf16.mxu0 %v1500_v21 }
  0x7c   :  { %1277 = vmatpush3.bf16.msra.mxu1 %v1378_v30 }
  0x7d   :  { %1278 = vmatprep.subr.bf16.mxu1 %v1500_v21 }
  0x7e   :  { %1259 = vmatpush3.bf16.msra.mxu0 %v1371_v23 }
  0x7f   :  { %1260 = vmatprep.subr.bf16.mxu0 %v1500_v21 }
  0x80   :  { %1279 = vmatpush3.bf16.msra.mxu1 %v1379_v31 }
  0x81   :  { %1280 = vmatprep.subr.bf16.mxu1 %v1500_v21 }
  0x82   :  { %1261 = vmatpush3.bf16.msra.mxu0 %v1372_v24 }
  0x83   :  { %1262 = vmatprep.subr.bf16.mxu0 %v1500_v21 }
  0x84   :  { %1281 = vmatpush3.bf16.msra.mxu1 %v1380_v32 }
  0x85   :  { %1282 = vmatprep.subr.bf16.mxu1 %v1500_v21 }
  0x86   :  { %1263 = vmatpush3.bf16.msra.mxu0 %v1373_v25 }
  0x87   :  { %1264 = vmatprep.subr.bf16.mxu0 %v1500_v21 }
  0x88   :  { %1283 = vmatpush3.bf16.msra.mxu1 %v1381_v33 }
  0x89   :  { %1284 = vmatprep.subr.bf16.mxu1 %v1500_v21 }
  0x8a   :  { %1265 = vmatpush3.bf16.msra.mxu0 %v1374_v26 }
  0x8b   :  { %1266 = vmatprep.subr.bf16.mxu0 %v1500_v21 }
  0x8c   :  { %1285 = vmatpush3.bf16.msra.mxu1 %v1382_v34 }
  0x8d   :  { %1286 = vmatprep.subr.bf16.mxu1 %v1500_v21 }
  0x8e   :  { %1267 = vmatpush3.bf16.msra.mxu0 %v1375_v27 }
  0x8f   :  { %1268 = vmatprep.subr.bf16.mxu0 %v1500_v21 }
  0x90   :  { %1287 = vmatpush3.bf16.msra.mxu1 %v1383_v63 }
  0x91   :  { %1288 = vmatprep.subr.bf16.mxu1 %v1500_v21 }
  0x92   :  { %1269 = vmatpush3.bf16.msra.mxu0 %v1376_v28 }
  0x94   :  { %1289 = vmatpush3.bf16.msra.mxu1 %v1384_v0 }
 0x115   :  { %v1164_v35 = vpop.f32.mrf.mxu0 }
 0x116   :  { %v1186_v36 = vpop.f32.mrf.mxu1 }
 0x117   :  { %v1165_v37 = vpop.f32.mrf.mxu0 }
 0x118   :  { %v1187_v38 = vpop.f32.mrf.mxu1  ;;  %v1166_v43 = vadd.f32 %v1165_v37, %v1164_v35 }
 0x119   :  { %v1167_v39 = vpop.f32.mrf.mxu0  ;;  %v1188_v46 = vadd.f32 %v1187_v38, %v1186_v36 }
 0x11a   :  { %v1189_v40 = vpop.f32.mrf.mxu1  ;;  %v694_v45 = vadd.f32 %v1166_v43, %v1065_v44 }
 0x11b   :  { %v1168_v41 = vpop.f32.mrf.mxu0 }
 0x11c   :  { %v1190_v42 = vpop.f32.mrf.mxu1  ;;  %v734_v50 = vadd.f32 %v1188_v46, %v694_v45 }
 0x135   :  { %v1208_v47 = vpop.f32.mrf.mxu0 }
 0x136   :  { %v1230_v48 = vpop.f32.mrf.mxu1 }
 0x137   :  { %v1209_v49 = vpop.f32.mrf.mxu0 }
 0x138   :  { %v1210_v51 = vadd.f32 %v1209_v49, %v1208_v47  ;;  %v1231_v52 = vpop.f32.mrf.mxu1 }
 0x139   :  { %v1211_v53 = vpop.f32.mrf.mxu0  ;;  %v1232_v55 = vadd.f32 %v1231_v52, %v1230_v48 }
 0x13a   :  { %v774_v54 = vadd.f32 %v1210_v51, %v734_v50  ;;  %v1233_v56 = vpop.f32.mrf.mxu1 }
 0x13b   :  { %v1212_v57 = vpop.f32.mrf.mxu0 }
 0x13c   :  { %v814_v58 = vadd.f32 %v1232_v55, %v774_v54  ;;  %v1234_v59 = vpop.f32.mrf.mxu1 }
 0x13e   :  { %v819_v60 = vmul.f32 0.01, %v814_v58 }
 0x140   :  { %v820_v61 = vmax.f32 %v814_v58, %v819_v60 }
 0x142   :  { %v821_v62 = vpack.c.bf16 %v820_v61, %v820_v61 }
 0x144   :  { %1271 = vmatmul.mubr.bf16.vlgmr.msra.gmra.mxu0 %v821_v62 }
 0x204   :  { %v927_v2 = vpop.f32.mrf.mxu0 }
 0x205   :  { %v928_v3 = vadd.f32 %v1130_v1, %v927_v2 }
 0x206   :  { %v1272_v4 = vpop.f32.mrf.mxu0 }
 0x207   :  { %v933_v5 = vmul.f32 0.01, %v928_v3 }
 0x208   :  { %v930_v6 = vpop.f32.mrf.mxu0 }
 0x209   :  { %v934_v7 = vmax.f32 %v928_v3, %v933_v5 }
 0x20a   :  { %v1273_v8 = vpop.f32.mrf.mxu0 }
 0x20b   :  { %v935_v9 = vpack.c.bf16 %v934_v7, %v934_v7 }
 0x20d   :  { %1291 = vmatmul.mubr.bf16.vlgmr.msra.gmra.mxu1 %v935_v9 }
 0x2cd   :  { %v1041_v11 = vpop.f32.mrf.mxu1 }
 0x2ce   :  { %v1042_v12 = vadd.f32 %v1139_v10, %v1041_v11 }
 0x2cf   :  { %v1292_v13 = vpop.f32.mrf.mxu1 }
 0x2d0   :  { %1047 = vst [vmem:[#allocation10] sm:$0x3] %v1042_v12 }
 0x2d1   :  { %v1044_v14 = vpop.f32.mrf.mxu1 }
 0x2d2   :  { %1476 = shalt.err (!%p1473_p10)
}
 0x2d3   :  { %1057 = dma.vmem_to_hbm [thread:$0]  %s1055_s25, 32, %s1614_s7, [#allocation4]   ;;  %v1293_v15 = vpop.f32.mrf.mxu1 }
 0x2d4   :  { %1491 = dma.done.wait [#allocation4], 32  }
 0x2d5   :  { %1492 = vsyncadd [#allocation4], 4294967264 }
 0x2d6   :  { %1061 = vsyncpa [#allocation3], 1 }
 0x2d7   :  { %1062 = vsyncpa [#allocation6], 1 }
 0x2d8   :  { %1063 = vsyncpa [#allocation9], 1 }
 0x2d9   :  { %1064 = vsyncpa [#allocation4], 1 }

</bundles_post_ra>
